<compile_context>
chip_gen: v5e
topology: v5e:2x2
jax: 0.10.0
libtpu: 0.0.40
codegen_flags: <defaults>
</compile_context>

<pallas_src>
import jax
import jax.numpy as jnp
from jax.experimental import pallas as pl
from jax.experimental.pallas import tpu as pltpu


def _round_up(x, m):
    return ((x + m - 1) // m) * m


def _vmem_capacity_bytes():
    """Physical VMEM per TensorCore; conservative fallback if the query fails."""
    try:
        return int(pltpu.get_tpu_info().vmem_capacity_bytes)
    except Exception:
        return 64 << 20  # v7x per-TC size (most restrictive generation)


def _gelu_tanh(x):
    # GELU with tanh approximation, identical to torch.nn.GELU(approximate='tanh').
    c = jnp.sqrt(2.0 / jnp.pi).astype(x.dtype)
    return 0.5 * x * (1.0 + jnp.tanh(c * (x + 0.044715 * x * x * x)))


def _fused_kernel(x_ref, w1_ref, b1_ref, w2_ref, b2_ref, o_ref):
    """linear_1 -> GELU(tanh) -> linear_2 on one (tm, C_in) row tile.

    Weights fully resident in VMEM (single-buffered)."""
    # Cast the activation in VMEM (x arrives in the caller's dtype).
    x = x_ref[...].astype(w1_ref.dtype)
    h = jnp.dot(x, w1_ref[...], preferred_element_type=jnp.float32)
    h = h + b1_ref[...]                      # bias + GELU kept in f32 (v5e-safe)
    g = _gelu_tanh(h).astype(w2_ref.dtype)   # feed MXU in the compute dtype
    o = jnp.dot(g, w2_ref[...], preferred_element_type=jnp.float32)
    o_ref[...] = (o + b2_ref[...]).astype(o_ref.dtype)


def _chunked_kernel(x_ref, w1_ref, b1_ref, w2_ref, b2_ref, o_ref, acc_ref):
    """Hidden-axis-chunked variant for when W1+W2 don't fit VMEM (v7x, huge H).

    Grid = (row_tiles, hidden_chunks); hidden chunk is the trailing reduction
    axis for the second matmul, accumulated in an f32 scratch."""
    k = pl.program_id(1)

    @pl.when(k == 0)
    def _():
        acc_ref[...] = jnp.zeros_like(acc_ref)

    x = x_ref[...].astype(w1_ref.dtype)
    h = jnp.dot(x, w1_ref[...], preferred_element_type=jnp.float32)
    h = h + b1_ref[...]
    g = _gelu_tanh(h).astype(w2_ref.dtype)
    acc_ref[...] += jnp.dot(g, w2_ref[...], preferred_element_type=jnp.float32)

    @pl.when(k == pl.num_programs(1) - 1)
    def _():
        o_ref[...] = (acc_ref[...] + b2_ref[...]).astype(o_ref.dtype)


def _pick_hidden_chunk(hidden, max_chunk=512):
    for th in (512, 384, 256, 128):
        if th <= max_chunk and th < hidden and hidden % th == 0:
            return th
    return None


def prepare_caption_projection_params(w1, b1, w2, b2, compute_dtype=jnp.bfloat16):
    """Cast/lay out the parameters ONCE at init (not per forward call).

    Avoids a per-call f32->bf16 convert that re-reads the full weights from HBM."""
    return (w1.astype(compute_dtype),
            b1.reshape(1, -1).astype(jnp.float32),
            w2.astype(compute_dtype),
            b2.reshape(1, -1).astype(jnp.float32))


def caption_projection(caption, w1, b1, w2, b2, *, tile_rows=None,
                       compute_dtype=jnp.bfloat16):
    """caption: (..., C_in)   w1: (C_in, H)  b1: (H,)|(1,H)  w2: (H, H)  b2: (H,)|(1,H)

    Returns (..., H) in caption.dtype. Pre-cast weights with
    prepare_caption_projection_params for best performance (the .astype below
    is then a no-op)."""
    *lead, c_in = caption.shape
    hidden = w1.shape[1]
    rows = 1
    for d in lead:
        rows *= d
    out_dtype = caption.dtype

    # Parameter layout (no-ops when prepare_caption_projection_params was used).
    w1c = w1.astype(compute_dtype)
    w2c = w2.astype(compute_dtype)
    b1_2d = b1.reshape(1, hidden).astype(jnp.float32)
    b2_2d = b2.reshape(1, hidden).astype(jnp.float32)

    cbytes = jnp.dtype(compute_dtype).itemsize
    xbytes = jnp.dtype(caption.dtype).itemsize
    obytes = jnp.dtype(out_dtype).itemsize

    # ---- generation-aware VMEM budget -------------------------------------
    vmem_cap = _vmem_capacity_bytes()
    ceiling = int(vmem_cap * 0.8)            # headroom for Mosaic internal scratch

    if tile_rows is None:
        # 128 MiB parts (v5e/v6e) take bigger row tiles than v7x (64 MiB).
        tile_rows = 512 if vmem_cap >= (96 << 20) else 256

    # ---- row tiling ---------------------------------------------------------
    # Big tiles, but aim for >= 2 grid steps so v7x's two TensorCores both get
    # work; tm aligned to 16 (bf16 sublane packing).
    tm = min(tile_rows, max(16, _round_up(pl.cdiv(rows, 2), 16)))
    pad_rows = 0
    if tm > rows:
        tm = _round_up(rows, 8)              # single tile; pad at most 7 rows
        pad_rows = tm - rows

    x2d = caption.reshape(rows, c_in)
    if pad_rows:
        x2d = jnp.pad(x2d, ((0, pad_rows), (0, 0)))
    rows_out = rows + pad_rows
    n_row_tiles = pl.cdiv(rows_out, tm)

    keep = pl.Buffered(1)                    # constant index_map -> 1 buffer

    # ---- path selection: resident weights vs chunked hidden axis -----------
    weight_resident = (c_in * hidden + hidden * hidden) * cbytes + 2 * hidden * 4
    tile_bytes = (2 * tm * c_in * xbytes     # x tile, double-buffered
                  + 2 * tm * hidden * obytes  # out tile, double-buffered
                  + 2 * tm * hidden * 4)      # f32 h/g intermediates
    fused_est = weight_resident + tile_bytes

    th = _pick_hidden_chunk(hidden)
    use_chunked = (fused_est > ceiling) and (th is not None)

    if not use_chunked:
        vmem_limit = min(ceiling, max(16 << 20, int(fused_est * 3 // 2) + (2 << 20)))
        out = pl.pallas_call(
            _fused_kernel,
            out_shape=jax.ShapeDtypeStruct((rows_out, hidden), out_dtype),
            grid_spec=pl.GridSpec(
                grid=(n_row_tiles,),
                in_specs=[
                    pl.BlockSpec((tm, c_in), lambda i: (i, 0)),          # x row-tile
                    pl.BlockSpec((c_in, hidden), lambda i: (0, 0),
                                 pipeline_mode=keep),                    # W1 resident
                    pl.BlockSpec((1, hidden), lambda i: (0, 0),
                                 pipeline_mode=keep),                    # b1
                    pl.BlockSpec((hidden, hidden), lambda i: (0, 0),
                                 pipeline_mode=keep),                    # W2 resident
                    pl.BlockSpec((1, hidden), lambda i: (0, 0),
                                 pipeline_mode=keep),                    # b2
                ],
                out_specs=pl.BlockSpec((tm, hidden), lambda i: (i, 0)),  # lane-dense
            ),
            compiler_params=pltpu.CompilerParams(
                dimension_semantics=("parallel",),
                vmem_limit_bytes=vmem_limit,
            ),
        )(x2d, w1c, b1_2d, w2c, b2_2d)
    else:
        # Weights too big to keep resident (e.g. C_in=H=4096 on v7x): stream
        # hidden-axis chunks of W1/W2 and accumulate the second matmul in f32.
        n_h = hidden // th
        chunk_est = (2 * (c_in * th + th * hidden) * cbytes   # W chunks, dbl-buf
                     + 2 * th * 4 + hidden * 4                # b1 chunk + b2
                     + 2 * tm * c_in * xbytes
                     + 2 * tm * hidden * obytes
                     + tm * hidden * 4                        # acc scratch
                     + 2 * tm * th * 4)                       # h/g chunk intermediates
        vmem_limit = min(ceiling, max(16 << 20, int(chunk_est * 3 // 2) + (2 << 20)))
        out = pl.pallas_call(
            _chunked_kernel,
            out_shape=jax.ShapeDtypeStruct((rows_out, hidden), out_dtype),
            grid_spec=pl.GridSpec(
                grid=(n_row_tiles, n_h),
                in_specs=[
                    pl.BlockSpec((tm, c_in), lambda i, k: (i, 0)),       # x (held over k)
                    pl.BlockSpec((c_in, th), lambda i, k: (0, k)),       # W1[:, chunk]
                    pl.BlockSpec((1, th), lambda i, k: (0, k)),          # b1[chunk]
                    pl.BlockSpec((th, hidden), lambda i, k: (k, 0)),     # W2[chunk, :]
                    pl.BlockSpec((1, hidden), lambda i, k: (0, 0),
                                 pipeline_mode=keep),                    # b2
                ],
                out_specs=pl.BlockSpec((tm, hidden), lambda i, k: (i, 0)),
                scratch_shapes=[pltpu.VMEM((tm, hidden), jnp.float32)],
            ),
            compiler_params=pltpu.CompilerParams(
                dimension_semantics=("parallel", "arbitrary"),
                vmem_limit_bytes=vmem_limit,
            ),
        )(x2d, w1c, b1_2d, w2c, b2_2d)

    if pad_rows:
        out = out[:rows]
    return out.reshape(*lead, hidden)


if __name__ == "__main__":
    # Small shapes consistent with the module: B=2, T=8 tokens, C_in=32, H=32.
    B, T, C_IN, HIDDEN, NUM_TOKENS = 2, 8, 32, 32, 120

    key = jax.random.PRNGKey(0)
    k_cap, k_w1, k_b1, k_w2, k_b2, k_yemb = jax.random.split(key, 6)

    caption = jax.random.normal(k_cap, (B, T, C_IN), dtype=jnp.float32)

    # Deterministic parameter init (shapes from the module's __init__).
    # Stored transposed vs torch's (out_features, in_features).
    w1 = jax.random.normal(k_w1, (C_IN, HIDDEN), dtype=jnp.float32) * (1.0 / C_IN ** 0.5)
    b1 = jax.random.normal(k_b1, (HIDDEN,), dtype=jnp.float32) * 0.01
    w2 = jax.random.normal(k_w2, (HIDDEN, HIDDEN), dtype=jnp.float32) * (1.0 / HIDDEN ** 0.5)
    b2 = jax.random.normal(k_b2, (HIDDEN,), dtype=jnp.float32) * 0.01
    # y_embedding buffer exists on the module but is unused in forward().
    y_embedding = jax.random.normal(k_yemb, (NUM_TOKENS, C_IN), dtype=jnp.float32) / C_IN ** 0.5

    def ref_forward(x):
        h = x @ w1 + b1
        h = 0.5 * h * (1.0 + jnp.tanh(jnp.sqrt(2.0 / jnp.pi) * (h + 0.044715 * h ** 3)))
        return h @ w2 + b2

    ref = ref_forward(caption)

    # 1) f32 compute path: exact semantics check.
    out_f32 = caption_projection(caption, w1, b1, w2, b2, compute_dtype=jnp.float32)
    out_f32 = jax.block_until_ready(out_f32)
    assert out_f32.shape == (B, T, HIDDEN), out_f32.shape
    assert jnp.allclose(out_f32, ref, atol=1e-5, rtol=1e-5), \
        float(jnp.max(jnp.abs(out_f32 - ref)))

    # 2) production bf16-MXU path with pre-cast (persistent) weights.
    w1b, b1b, w2b, b2b = prepare_caption_projection_params(w1, b1, w2, b2)
    out_bf16 = caption_projection(caption, w1b, b1b, w2b, b2b)   # compute_dtype=bf16
    out_bf16 = jax.block_until_ready(out_bf16)
    assert out_bf16.shape == (B, T, HIDDEN), out_bf16.shape
    assert jnp.allclose(out_bf16, ref, atol=5e-2, rtol=5e-2), \
        float(jnp.max(jnp.abs(out_bf16 - ref)))

    # 3) ragged row count: exercises the no-pad partial tail-block path.
    cap2 = jax.random.normal(k_cap, (1, 40, C_IN), dtype=jnp.float32)
    ref2 = ref_forward(cap2)
    out2 = caption_projection(cap2, w1, b1, w2, b2,
                              compute_dtype=jnp.float32, tile_rows=32)
    out2 = jax.block_until_ready(out2)
    assert out2.shape == (1, 40, HIDDEN), out2.shape
    assert jnp.allclose(out2, ref2, atol=1e-4, rtol=1e-4), \
        float(jnp.max(jnp.abs(out2 - ref2)))

    print("KERNEL_OK")
</pallas_src>

<mosaic_0001>
module attributes {stable_mosaic.version = 11 : i64} {
  func.func @_fused_kernel(%arg0: i32, %arg1: memref<16x32xf32, #tpu.memory_space<vmem>>, %arg2: memref<32x32xf32, #tpu.memory_space<vmem>>, %arg3: memref<1x32xf32, #tpu.memory_space<vmem>>, %arg4: memref<32x32xf32, #tpu.memory_space<vmem>>, %arg5: memref<1x32xf32, #tpu.memory_space<vmem>>, %arg6: memref<16x32xf32, #tpu.memory_space<vmem>>) attributes {dimension_semantics = [#tpu.dimension_semantics<parallel>], iteration_bounds = array<i64: 1>, scalar_prefetch = 0 : i64, scratch_operands = 0 : i64, tpu.core_type = #tpu.core_type<tc>, window_params = [{transform_indices = @transform_0, window_bounds = array<i64: 16, 32>}, {pipeline_mode = #tpu.pipeline_mode<synchronous>, transform_indices = @transform_1, window_bounds = array<i64: 32, 32>}, {pipeline_mode = #tpu.pipeline_mode<synchronous>, transform_indices = @transform_2, window_bounds = array<i64: 1, 32>}, {pipeline_mode = #tpu.pipeline_mode<synchronous>, transform_indices = @transform_3, window_bounds = array<i64: 32, 32>}, {pipeline_mode = #tpu.pipeline_mode<synchronous>, transform_indices = @transform_4, window_bounds = array<i64: 1, 32>}, {transform_indices = @transform_5, window_bounds = array<i64: 16, 32>}]} {
    %c0 = arith.constant 0 : index
    %c0_0 = arith.constant 0 : index
    %0 = vector.load %arg1[%c0, %c0_0] : memref<16x32xf32, #tpu.memory_space<vmem>>, vector<16x32xf32>
    %c0_1 = arith.constant 0 : index
    %c0_2 = arith.constant 0 : index
    %1 = vector.load %arg2[%c0_1, %c0_2] : memref<32x32xf32, #tpu.memory_space<vmem>>, vector<32x32xf32>
    %cst = arith.constant dense<0.000000e+00> : vector<16x32xf32>
    %2 = tpu.matmul %0, %1, %cst {dimension_numbers = #tpu.dot_dimension_numbers<[1], [0], [0], [1], [0, 0, 1, 1], [], []>} : vector<16x32xf32>, vector<32x32xf32>, vector<16x32xf32> -> vector<16x32xf32>
    %c0_3 = arith.constant 0 : index
    %c0_4 = arith.constant 0 : index
    %3 = vector.load %arg3[%c0_3, %c0_4] : memref<1x32xf32, #tpu.memory_space<vmem>>, vector<1x32xf32>
    %4 = vector.broadcast %3 : vector<1x32xf32> to vector<16x32xf32>
    %5 = arith.addf %2, %4 : vector<16x32xf32>
    %cst_5 = arith.constant 0.636619746 : f32
    %6 = math.sqrt %cst_5 : f32
    %cst_6 = arith.constant 5.000000e-01 : f32
    %7 = vector.broadcast %cst_6 : f32 to vector<16x32xf32>
    %8 = arith.mulf %7, %5 : vector<16x32xf32>
    %cst_7 = arith.constant 4.471500e-02 : f32
    %9 = vector.broadcast %cst_7 : f32 to vector<16x32xf32>
    %10 = arith.mulf %9, %5 : vector<16x32xf32>
    %11 = arith.mulf %10, %5 : vector<16x32xf32>
    %12 = arith.mulf %11, %5 : vector<16x32xf32>
    %13 = arith.addf %5, %12 : vector<16x32xf32>
    %14 = vector.broadcast %6 : f32 to vector<16x32xf32>
    %15 = arith.mulf %14, %13 : vector<16x32xf32>
    %16 = math.tanh %15 : vector<16x32xf32>
    %cst_8 = arith.constant 1.000000e+00 : f32
    %17 = vector.broadcast %cst_8 : f32 to vector<16x32xf32>
    %18 = arith.addf %17, %16 : vector<16x32xf32>
    %19 = arith.mulf %8, %18 : vector<16x32xf32>
    %c0_9 = arith.constant 0 : index
    %c0_10 = arith.constant 0 : index
    %20 = vector.load %arg4[%c0_9, %c0_10] : memref<32x32xf32, #tpu.memory_space<vmem>>, vector<32x32xf32>
    %cst_11 = arith.constant dense<0.000000e+00> : vector<16x32xf32>
    %21 = tpu.matmul %19, %20, %cst_11 {dimension_numbers = #tpu.dot_dimension_numbers<[1], [0], [0], [1], [0, 0, 1, 1], [], []>} : vector<16x32xf32>, vector<32x32xf32>, vector<16x32xf32> -> vector<16x32xf32>
    %c0_12 = arith.constant 0 : index
    %c0_13 = arith.constant 0 : index
    %22 = vector.load %arg5[%c0_12, %c0_13] : memref<1x32xf32, #tpu.memory_space<vmem>>, vector<1x32xf32>
    %23 = vector.broadcast %22 : vector<1x32xf32> to vector<16x32xf32>
    %24 = arith.addf %21, %23 : vector<16x32xf32>
    %c0_14 = arith.constant 0 : index
    %c0_15 = arith.constant 0 : index
    %25 = vector.load %arg6[%c0_14, %c0_15] : memref<16x32xf32, #tpu.memory_space<vmem>>, vector<16x32xf32>
    tpu.vector_store %arg6[%c0_14, %c0_15], %24 {strides = array<i32>} : memref<16x32xf32, #tpu.memory_space<vmem>>, vector<16x32xf32>,
    return
  }
  func.func @transform_0(%arg0: i32) -> (i32, i32) {
    %c0_i32 = arith.constant 0 : i32
    %c0_i32_0 = arith.constant 0 : i32
    return %arg0, %c0_i32 : i32, i32
  }
  func.func @transform_1(%arg0: i32) -> (i32, i32) {
    %c0_i32 = arith.constant 0 : i32
    %c0_i32_0 = arith.constant 0 : i32
    %c0_i32_1 = arith.constant 0 : i32
    return %c0_i32, %c0_i32_0 : i32, i32
  }
  func.func @transform_2(%arg0: i32) -> (i32, i32) {
    %c0_i32 = arith.constant 0 : i32
    %c0_i32_0 = arith.constant 0 : i32
    %c0_i32_1 = arith.constant 0 : i32
    return %c0_i32, %c0_i32_0 : i32, i32
  }
  func.func @transform_3(%arg0: i32) -> (i32, i32) {
    %c0_i32 = arith.constant 0 : i32
    %c0_i32_0 = arith.constant 0 : i32
    %c0_i32_1 = arith.constant 0 : i32
    return %c0_i32, %c0_i32_0 : i32, i32
  }
  func.func @transform_4(%arg0: i32) -> (i32, i32) {
    %c0_i32 = arith.constant 0 : i32
    %c0_i32_0 = arith.constant 0 : i32
    %c0_i32_1 = arith.constant 0 : i32
    return %c0_i32, %c0_i32_0 : i32, i32
  }
  func.func @transform_5(%arg0: i32) -> (i32, i32) {
    %c0_i32 = arith.constant 0 : i32
    %c0_i32_0 = arith.constant 0 : i32
    return %arg0, %c0_i32 : i32, i32
  }
}

</mosaic_0001>

<bundles_post_ra>
// kernel: tpu_custom_call.1
= control target key start
LH: loop header
LB: loop body
LE: loop exit
PB: predicated region body
PF: predicated region fallthrough
CT: control target
= control target key end

     0   :  { %10 = vsyncpa [#allocation3], 0  ;;  %s383_s0 = inlined_call_operand.hbm [shape: f32[16,32], index: 0, kind: input, shape index: {}]   ;;  %s384_s1 = inlined_call_operand.hbm [shape: f32[32,32], index: 1, kind: input, shape index: {}]   ;;  %s385_s2 = inlined_call_operand.vmem [shape: f32[1,32], index: 2, kind: input, shape index: {}]   ;;  %s386_s3 = inlined_call_operand.hbm [shape: f32[32,32], index: 3, kind: input, shape index: {}]   ;;  %s387_s4 = inlined_call_operand.vmem [shape: f32[1,32], index: 4, kind: input, shape index: {}]   ;;  %s388_s5 = inlined_call_operand.hbm [shape: f32[16,32], index: 5, kind: output, shape index: {}]  }
   0x1   :  { %11 = vsyncpa [#allocation6], 0 }
   0x2   :  { %12 = vsyncpa [#allocation4], 0  ;;  %s30_s20 = sshll.u32 %s384_s1, 4  ;;  %s311_s21 = smov [#allocation5]   ;;  %s31_s20 = int_to_ptr.hbm [resolvable:$true] %s30_s20 }
   0x3   :  { %s32_s22 = sshll.u32 %s311_s21, 4  ;;  %s17_s25 = sshll.u32 %s383_s0, 4  ;;  %s33_s22 = int_to_ptr.vmem [resolvable:$true] %s32_s22  ;;  %s18_s25 = int_to_ptr.hbm [resolvable:$true] %s17_s25 }
   0x4   :  { %s312_s26 = smov 128   ;;  %s313_s27 = smov 8  }
   0x5   :  { %38 = dma.hbm_to_vmem [thread:$0]  %s31_s20, 512, %s33_s22, [#allocation6], %s312_s26, %s312_s26, %s313_s27  }
   0x6   :  { %s314_s28 = smov [#allocation2]   ;;  %s45_s1 = sshll.u32 %s386_s3, 4  ;;  %s46_s1 = int_to_ptr.hbm [resolvable:$true] %s45_s1 }
   0x7   :  { %s19_s29 = sshll.u32 %s314_s28, 4  ;;  %s315_s0 = smov [#allocation7]   ;;  %s20_s29 = int_to_ptr.vmem [resolvable:$true] %s19_s29 }
   0x8   :  { %25 = dma.hbm_to_vmem [thread:$0]  %s18_s25, 256, %s20_s29, [#allocation3], %s312_s26, %s312_s26, %s313_s27  }
   0x9   :  { %s47_s7 = sshll.u32 %s315_s0, 4  ;;  %s48_s7 = int_to_ptr.vmem [resolvable:$true] %s47_s7 }
   0xa   :  { %53 = dma.hbm_to_vmem [thread:$0]  %s46_s1, 512, %s48_s7, [#allocation6], %s312_s26, %s312_s26, %s313_s27  }
   0xb   :  { %305 = dma.done.wait [#allocation3], 256  }
   0xc   :  { %306 = vsyncadd [#allocation3], 4294967040 }
   0xd   :  { %307 = dma.done.wait [#allocation6], 1024  }
   0xe   :  { %308 = vsyncadd [#allocation6], 4294966272  ;;  %v73_v0 = vld [vmem:[#allocation5 + $0x18] sm:$0xff]  ;;  %v72_v1 = vld [vmem:[#allocation5 + $0x10] sm:$0xff]  ;;  %vm78_vm0 = vcmask 261120   ;;  %s316_s10 = smov [#allocation8]  }
   0xf   :  { %97 = vmatpush.msra.mxu0 %v73_v0  ;;  %189 = vmatpush.msra.mxu2 %v73_v0  ;;  %v71_v2 = vld [vmem:[#allocation5 + $0x8] sm:$0xff]  ;;  %v70_v3 = vld [vmem:[#allocation5] sm:$0xff]  ;;  %v68_v4 = vld [vmem:[#allocation2] sm:$0xff]  ;;  %s169_s11 = sshll.u32 %s316_s10, 4  ;;  %s171_s14 = sshll.u32 %s388_s5, 4  ;;  %s170_s11 = int_to_ptr.vmem [resolvable:$true] %s169_s11  ;;  %s172_s14 = int_to_ptr.hbm [resolvable:$true] %s171_s14 }
  0x10   :  { %v69_v5 = vld [vmem:[#allocation2 + $0x8] sm:$0xff]  ;;  %v128_v7 = vld [vmem:[#allocation7 + $0x10] sm:$0xff]  ;;  %v127_v8 = vld [vmem:[#allocation7 + $0x8] sm:$0xff] }
  0x11   :  { %98 = vmatpush.msra.mxu0 %v72_v1  ;;  %190 = vmatpush.msra.mxu2 %v72_v1  ;;  %v129_v6 = vld [vmem:[#allocation7 + $0x18] sm:$0xff]  ;;  %v126_v9 = vld [vmem:[#allocation7] sm:$0xff]  ;;  %v203_v10 = vld [vmem:[%s385_s2] ss:$0 sm:$0xff] }
  0x12   :  { %152 = vmatpush.msra.mxu1 %v129_v6  ;;  %193 = vmatpush.msra.mxu3 %v129_v6  ;;  %v204_v33 = vld [vmem:[%s387_s4] ss:$0 sm:$0xff] }
  0x13   :  { %99 = vmatpush.msra.mxu0 %v71_v2  ;;  %191 = vmatpush.msra.mxu2 %v71_v2 }
  0x14   :  { %153 = vmatpush.msra.mxu1 %v128_v7  ;;  %194 = vmatpush.msra.mxu3 %v128_v7 }
  0x15   :  { %100 = vmatpush.msra.mxu0 %v70_v3  ;;  %192 = vmatpush.msra.mxu2 %v70_v3 }
  0x16   :  { %185 = vmatmul.msk.f32.vlgmr.msra.gmra.mxu0 %vm78_vm0, %v68_v4  ;;  %186 = vmatmul.msk.f32.vlgmr.msra.gmra.mxu2 %vm78_vm0, %v69_v5 }
  0x17   :  { %154 = vmatpush.msra.mxu1 %v127_v8  ;;  %195 = vmatpush.msra.mxu3 %v127_v8 }
  0x19   :  { %155 = vmatpush.msra.mxu1 %v126_v9  ;;  %196 = vmatpush.msra.mxu3 %v126_v9 }
  0x93   :  { %v102_v11 = vpop.f32.mrf.mxu0 }
  0x94   :  { %v103_v12 = vadd.f32 %v203_v10, %v102_v11 }
  0x96   :  { %v110_v13 = vmul.f32 0.044715, %v103_v12  ;;  %v108_v26 = vmul.f32 0.5, %v103_v12 }
  0x98   :  { %v112_v14 = vmul.f32 %v110_v13, %v103_v12 }
  0x99   :  { %v105_v15 = vpop.f32.mrf.mxu2 }
  0x9a   :  { %v106_v16 = vadd.f32 %v203_v10, %v105_v15  ;;  %v114_v17 = vmul.f32 %v112_v14, %v103_v12 }
  0x9c   :  { %v111_v18 = vmul.f32 0.044715, %v106_v16  ;;  %v116_v19 = vadd.f32 %v114_v17, %v103_v12  ;;  %v109_v30 = vmul.f32 0.5, %v106_v16 }
  0x9e   :  { %v118_v20 = vmul.f32 0.7978845, %v116_v19  ;;  %v113_v21 = vmul.f32 %v111_v18, %v106_v16 }
  0xa0   :  { %205 = vtanh.f32 %v118_v20  ;;  %v115_v22 = vmul.f32 %v113_v21, %v106_v16 }
  0xa2   :  { %v117_v23 = vadd.f32 %v115_v22, %v106_v16 }
  0xa4   :  { %v119_v24 = vmul.f32 0.7978845, %v117_v23 }
  0xa6   :  { %v206_v25 = vpop.eup %205  ;;  %207 = vtanh.f32 %v119_v24 }
  0xa7   :  { %v122_v27 = vadd.f32 1.0, %v206_v25 }
  0xa9   :  { %v124_v28 = vmul.f32 %v122_v27, %v108_v26 }
  0xab   :  { %187 = vmatmul.msk.f32.vlgmr.msra.gmra.mxu1 %vm78_vm0, %v124_v28 }
  0xac   :  { %v208_v29 = vpop.eup %207 }
  0xad   :  { %v123_v31 = vadd.f32 1.0, %v208_v29 }
  0xaf   :  { %v125_v32 = vmul.f32 %v123_v31, %v109_v30 }
  0xb1   :  { %188 = vmatmul.msk.f32.vlgmr.msra.gmra.mxu3 %vm78_vm0, %v125_v32 }
 0x128   :  { %v157_v34 = vpop.f32.mrf.mxu1 }
 0x129   :  { %v158_v35 = vadd.f32 %v204_v33, %v157_v34 }
 0x12b   :  { %163 = vst.msk [vmem:[#allocation8] sm:$0xff] %vm78_vm0, %v158_v35 }
 0x134   :  { %v160_v36 = vpop.f32.mrf.mxu3 }
 0x135   :  { %v161_v37 = vadd.f32 %v204_v33, %v160_v36 }
 0x137   :  { %164 = vst.msk [vmem:[#allocation8 + $0x8] sm:$0xff] %vm78_vm0, %v161_v37 }
 0x138   :  { %177 = dma.vmem_to_hbm [thread:$0]  %s170_s11, 256, %s172_s14, [#allocation4], %s312_s26, %s312_s26, %s313_s27  }
 0x139   :  { %309 = dma.done.wait [#allocation4], 256  }
 0x13a   :  { %310 = vsyncadd [#allocation4], 4294967040 }
 0x13b   :  { %182 = vsyncpa [#allocation3], 1 }
 0x13c   :  { %183 = vsyncpa [#allocation6], 1 }
 0x13d   :  { %184 = vsyncpa [#allocation4], 1 }

</bundles_post_ra>
